<compile_context>
chip_gen: v6e
topology: v6e:2x2x1
jax: 0.10.0
libtpu: 0.0.40
codegen_flags: <defaults>
</compile_context>

<pallas_src>
import jax
import jax.numpy as jnp
from jax.experimental import pallas as pl
from jax.experimental.pallas import tpu as pltpu

TRANSFORMER_DIM = 32      # transformer_dim
NUM_MASK_TOKENS = 3       # num_multimask_outputs
TOKENS_PAD = 8            # mask tokens padded to one sublane tile


# ----------------------------------------------------------------------------
# Pallas kernel: MaskDecoder.predict_masks hot path, one batch-chunk per step
# ----------------------------------------------------------------------------
def mask_decoder_kernel(tok_ref, src_ref, w0_ref, w12_ref, b_ref,
                        masks_ref, logits_ref):
    # tok_ref:    (Bb*TP, C)   flattened, T-padded mask tokens for this chunk
    # src_ref:    (Bb, C, HW)  flattened image embeddings
    # w0_ref:     (C, 2C)      fused layer-0 weight (pre-transposed: x @ W)
    # w12_ref:    (2, 2C, 2C)  fused block-diagonal layer-1/2 weights
    # b_ref:      (3, 1, 2C)   fused biases
    # masks_ref:  (Bb, T, HW)
    # logits_ref: (Bb, T, C)   similarity-head outputs (mean-reduced in wrapper)
    Bb, C, HW = src_ref.shape
    T = masks_ref.shape[1]
    TP = tok_ref.shape[0] // Bb

    # Fused 3-layer MLP: one pass over all Bb*TP token rows, both heads at once.
    x = tok_ref[...]                                                    # (Bb*TP, C)
    h = jnp.dot(x, w0_ref[...], preferred_element_type=jnp.float32) + b_ref[0]
    h = jnp.maximum(h, 0.0)
    h = jnp.dot(h, w12_ref[0], preferred_element_type=jnp.float32) + b_ref[1]
    h = jnp.maximum(h, 0.0)
    h = jnp.dot(h, w12_ref[1], preferred_element_type=jnp.float32) + b_ref[2]
    # h: (Bb*TP, 2C) = [hyper_in | sim_logits].  TP == 8, so this reshape is a
    # pure sublane-tile regrouping (no data movement).
    h3 = h.reshape(Bb, TP, 2 * C)

    logits_ref[...] = h3[:, :T, C:].astype(logits_ref.dtype)

    # masks[b] = hyper_in[b] @ src[b] : one batched MXU dot_general.
    masks = jnp.einsum("btc,bch->bth", h3[:, :, :C], src_ref[...],
                       preferred_element_type=jnp.float32)
    masks_ref[...] = masks[:, :T, :].astype(masks_ref.dtype)


# ----------------------------------------------------------------------------
# Wrapper (weight fusion, batching / padding, sims reduction in plain JAX)
# ----------------------------------------------------------------------------
def mask_decoder_pallas(mask_tokens_out, image_embeddings, sparse_prompts, params):
    B, T, C = mask_tokens_out.shape
    _, _, H, W = image_embeddings.shape
    HW = H * W
    C2 = 2 * C
    TP = TOKENS_PAD

    # ---- fuse + pre-transpose MLP weights once (hoisted out of the kernel) ----
    hw, hb = params["hyper_w"], params["hyper_b"]          # (3,C,C), (3,1,C)
    sw, sb = params["sim_w"], params["sim_b"]
    zeros = jnp.zeros((C, C), hw.dtype)
    w0t = jnp.concatenate([hw[0].T, sw[0].T], axis=1)                       # (C, 2C)
    w1t = jnp.concatenate([jnp.concatenate([hw[1].T, zeros], axis=1),
                           jnp.concatenate([zeros, sw[1].T], axis=1)], axis=0)
    w2t = jnp.concatenate([jnp.concatenate([hw[2].T, zeros], axis=1),
                           jnp.concatenate([zeros, sw[2].T], axis=1)], axis=0)
    w12t = jnp.stack([w1t, w2t], axis=0)                                    # (2, 2C, 2C)
    bias = jnp.concatenate([hb, sb], axis=-1)                               # (3, 1, 2C)

    # ---- choose batch chunk size ----
    # Memory-bound on the src read / masks write: pick the biggest Bb that fits
    # a VMEM budget, but keep >= 2 grid steps when possible so the auto-pipeline
    # overlaps DMA and megacore can shard the batch axis.
    per_b = 4 * (C * HW + T * HW + TP * C + T * C)      # per-batch VMEM bytes
    fixed = 4 * (C * C2 + 2 * C2 * C2 + 3 * C2)         # fused weights + biases
    BUDGET = 20 << 20                                    # single-buffer working set
    Bb = max(1, min(B, (BUDGET - fixed) // per_b))
    if B >= 2:
        Bb = min(Bb, pl.cdiv(B, 2))
    nb = pl.cdiv(B, Bb)
    B_pad = nb * Bb

    tok = jnp.pad(mask_tokens_out, ((0, B_pad - B), (0, TP - T), (0, 0)))
    tok_flat = tok.reshape(B_pad * TP, C)
    src_flat = jnp.pad(image_embeddings.reshape(B, C, HW),
                       ((0, B_pad - B), (0, 0), (0, 0)))

    flops = B_pad * (2 * TP * (C * C2 + 2 * C2 * C2) + 2 * TP * C * HW)
    bytes_accessed = 4 * (B_pad * TP * C + B_pad * C * HW + C * C2
                          + 2 * C2 * C2 + 3 * C2
                          + B_pad * T * HW + B_pad * T * C)
    vmem_limit = int(min(64 << 20, max(32 << 20,
                                       2 * (Bb * per_b + fixed) + (4 << 20))))

    masks, logits = pl.pallas_call(
        mask_decoder_kernel,
        out_shape=(jax.ShapeDtypeStruct((B_pad, T, HW), jnp.float32),
                   jax.ShapeDtypeStruct((B_pad, T, C), jnp.float32)),
        grid_spec=pltpu.PrefetchScalarGridSpec(
            num_scalar_prefetch=0,
            grid=(nb,),
            in_specs=[
                pl.BlockSpec((Bb * TP, C), lambda i: (i, 0)),     # padded tokens
                pl.BlockSpec((Bb, C, HW), lambda i: (i, 0, 0)),   # flattened src
                pl.BlockSpec((C, C2), lambda i: (0, 0)),          # fused layer-0 W^T
                pl.BlockSpec((2, C2, C2), lambda i: (0, 0, 0)),   # fused layer-1/2 W^T
                pl.BlockSpec((3, 1, C2), lambda i: (0, 0, 0)),    # fused biases
            ],
            out_specs=[
                pl.BlockSpec((Bb, T, HW), lambda i: (i, 0, 0)),
                pl.BlockSpec((Bb, T, C), lambda i: (i, 0, 0)),
            ],
        ),
        compiler_params=pltpu.CompilerParams(
            dimension_semantics=("parallel",),
            vmem_limit_bytes=vmem_limit,
        ),
        cost_estimate=pl.CostEstimate(flops=int(flops), transcendentals=0,
                                      bytes_accessed=int(bytes_accessed)),
    )(tok_flat, src_flat, w0t, w12t, bias)

    masks = masks[:B].reshape(B, T, H, W)
    logits = logits[:B]
    # mean over prompts commutes with the matmul:
    # (logits @ sp^T).mean(-1) == logits @ mean(sp, axis=1)
    sp_mean = jnp.mean(sparse_prompts, axis=1)                              # (B, C)
    sims = jnp.einsum("btc,bc->bt", logits, sp_mean)
    return masks, sims


# ----------------------------------------------------------------------------
# Full MaskDecoder.forward (token assembly + transformer stand-in in plain JAX)
# ----------------------------------------------------------------------------
def mask_decoder_forward(image_embeddings, sparse_prompts, params):
    B = sparse_prompts.shape[0]
    output_tokens = jnp.broadcast_to(params["mask_token_w"][None],
                                     (B, NUM_MASK_TOKENS, TRANSFORMER_DIM))
    tokens = jnp.concatenate([output_tokens, sparse_prompts], axis=1)

    # TODO(synk): `self.transformer` is an externally-injected nn.Module; it is
    # modeled here as a deterministic identity stand-in (hs = tokens, src = image_embeddings).
    hs, src = tokens, image_embeddings

    mask_tokens_out = hs[:, :NUM_MASK_TOKENS, :]
    return mask_decoder_pallas(mask_tokens_out, src, sparse_prompts, params)


# ----------------------------------------------------------------------------
# Pure-JAX reference for verification
# ----------------------------------------------------------------------------
def _mlp3_ref(x, w, b):
    h = jnp.maximum(x @ w[0].T + b[0, 0], 0.0)
    h = jnp.maximum(h @ w[1].T + b[1, 0], 0.0)
    return h @ w[2].T + b[2, 0]


def mask_decoder_reference(image_embeddings, sparse_prompts, params):
    B = sparse_prompts.shape[0]
    output_tokens = jnp.broadcast_to(params["mask_token_w"][None],
                                     (B, NUM_MASK_TOKENS, TRANSFORMER_DIM))
    tokens = jnp.concatenate([output_tokens, sparse_prompts], axis=1)
    hs, src = tokens, image_embeddings
    mask_tokens_out = hs[:, :NUM_MASK_TOKENS, :]

    hyper_in = jnp.stack([_mlp3_ref(mask_tokens_out[:, i, :],
                                    params["hyper_w"], params["hyper_b"])
                          for i in range(NUM_MASK_TOKENS)], axis=1)
    logits = jnp.stack([_mlp3_ref(mask_tokens_out[:, i, :],
                                  params["sim_w"], params["sim_b"])
                        for i in range(NUM_MASK_TOKENS)], axis=1)

    b, c, h, w = src.shape
    masks = (hyper_in @ src.reshape(b, c, h * w)).reshape(b, -1, h, w)
    sims = (logits @ jnp.swapaxes(sparse_prompts, 1, 2)).mean(axis=-1)
    return masks, sims


# ----------------------------------------------------------------------------
# Deterministic parameter init + example run
# ----------------------------------------------------------------------------
def init_params(key):
    ks = jax.random.split(key, 16)
    C = TRANSFORMER_DIM
    scale = 1.0 / jnp.sqrt(C)
    params = {
        "mask_token_w": jax.random.normal(ks[0], (NUM_MASK_TOKENS, C), jnp.float32),
        "hyper_w": jax.random.normal(ks[1], (3, C, C), jnp.float32) * scale,
        "hyper_b": jax.random.normal(ks[2], (3, 1, C), jnp.float32) * 0.01,
        "sim_w": jax.random.normal(ks[3], (3, C, C), jnp.float32) * scale,
        "sim_b": jax.random.normal(ks[4], (3, 1, C), jnp.float32) * 0.01,
    }
    return params


if __name__ == "__main__":
    key = jax.random.PRNGKey(0)
    k_params, k_img, k_sparse = jax.random.split(key, 3)

    B, C, H, W, L = 2, TRANSFORMER_DIM, 16, 16, 8
    params = init_params(k_params)
    image_embeddings = jax.random.normal(k_img, (B, C, H, W), jnp.float32)
    sparse_prompts = jax.random.normal(k_sparse, (B, L, C), jnp.float32)

    masks, sims = mask_decoder_forward(image_embeddings, sparse_prompts, params)
    jax.block_until_ready((masks, sims))

    masks_ref, sims_ref = mask_decoder_reference(image_embeddings, sparse_prompts, params)
    assert masks.shape == (B, NUM_MASK_TOKENS, H, W)
    assert sims.shape == (B, NUM_MASK_TOKENS)
    assert jnp.allclose(masks, masks_ref, atol=1e-3, rtol=1e-3)
    assert jnp.allclose(sims, sims_ref, atol=1e-3, rtol=1e-3)

    print("KERNEL_OK")
</pallas_src>

<mosaic_0001>
module attributes {stable_mosaic.version = 11 : i64} {
  func.func @mask_decoder_kernel(%arg0: i32, %arg1: memref<8x32xf32, #tpu.memory_space<vmem>>, %arg2: memref<1x32x256xf32, #tpu.memory_space<vmem>>, %arg3: memref<32x64xf32, #tpu.memory_space<vmem>>, %arg4: memref<2x64x64xf32, #tpu.memory_space<vmem>>, %arg5: memref<3x1x64xf32, #tpu.memory_space<vmem>>, %arg6: memref<1x3x256xf32, #tpu.memory_space<vmem>>, %arg7: memref<1x3x32xf32, #tpu.memory_space<vmem>>) attributes {dimension_semantics = [#tpu.dimension_semantics<parallel>], iteration_bounds = array<i64: 2>, scalar_prefetch = 0 : i64, scratch_operands = 0 : i64, tpu.core_type = #tpu.core_type<tc>, window_params = [{transform_indices = @transform_0, window_bounds = array<i64: 8, 32>}, {transform_indices = @transform_1, window_bounds = array<i64: 1, 32, 256>}, {pipeline_mode = #tpu.pipeline_mode<synchronous>, transform_indices = @transform_2, window_bounds = array<i64: 32, 64>}, {pipeline_mode = #tpu.pipeline_mode<synchronous>, transform_indices = @transform_3, window_bounds = array<i64: 2, 64, 64>}, {pipeline_mode = #tpu.pipeline_mode<synchronous>, transform_indices = @transform_4, window_bounds = array<i64: 3, 1, 64>}, {transform_indices = @transform_5, window_bounds = array<i64: 1, 3, 256>}, {transform_indices = @transform_6, window_bounds = array<i64: 1, 3, 32>}]} {
    %c0 = arith.constant 0 : index
    %c0_0 = arith.constant 0 : index
    %0 = vector.load %arg1[%c0, %c0_0] : memref<8x32xf32, #tpu.memory_space<vmem>>, vector<8x32xf32>
    %c0_1 = arith.constant 0 : index
    %c0_2 = arith.constant 0 : index
    %1 = vector.load %arg3[%c0_1, %c0_2] : memref<32x64xf32, #tpu.memory_space<vmem>>, vector<32x64xf32>
    %cst = arith.constant dense<0.000000e+00> : vector<8x64xf32>
    %2 = tpu.matmul %0, %1, %cst {dimension_numbers = #tpu.dot_dimension_numbers<[1], [0], [0], [1], [0, 0, 1, 1], [], []>} : vector<8x32xf32>, vector<32x64xf32>, vector<8x64xf32> -> vector<8x64xf32>
    %c0_3 = arith.constant 0 : index
    %c0_4 = arith.constant 0 : index
    %c0_5 = arith.constant 0 : index
    %3 = vector.load %arg5[%c0_3, %c0_4, %c0_5] : memref<3x1x64xf32, #tpu.memory_space<vmem>>, vector<1x1x64xf32>
    %4 = vector.shape_cast %3 : vector<1x1x64xf32> to vector<1x64xf32>
    %5 = vector.broadcast %4 : vector<1x64xf32> to vector<8x64xf32>
    %6 = arith.addf %2, %5 : vector<8x64xf32>
    %cst_6 = arith.constant 0.000000e+00 : f32
    %7 = vector.broadcast %cst_6 : f32 to vector<8x64xf32>
    %8 = arith.maximumf %6, %7 : vector<8x64xf32>
    %c0_7 = arith.constant 0 : index
    %c0_8 = arith.constant 0 : index
    %c0_9 = arith.constant 0 : index
    %9 = vector.load %arg4[%c0_7, %c0_8, %c0_9] : memref<2x64x64xf32, #tpu.memory_space<vmem>>, vector<1x64x64xf32>
    %10 = vector.shape_cast %9 : vector<1x64x64xf32> to vector<64x64xf32>
    %cst_10 = arith.constant dense<0.000000e+00> : vector<8x64xf32>
    %11 = tpu.matmul %8, %10, %cst_10 {dimension_numbers = #tpu.dot_dimension_numbers<[1], [0], [0], [1], [0, 0, 1, 1], [], []>} : vector<8x64xf32>, vector<64x64xf32>, vector<8x64xf32> -> vector<8x64xf32>
    %c1 = arith.constant 1 : index
    %c0_11 = arith.constant 0 : index
    %c0_12 = arith.constant 0 : index
    %12 = vector.load %arg5[%c1, %c0_11, %c0_12] : memref<3x1x64xf32, #tpu.memory_space<vmem>>, vector<1x1x64xf32>
    %13 = vector.shape_cast %12 : vector<1x1x64xf32> to vector<1x64xf32>
    %14 = vector.broadcast %13 : vector<1x64xf32> to vector<8x64xf32>
    %15 = arith.addf %11, %14 : vector<8x64xf32>
    %cst_13 = arith.constant 0.000000e+00 : f32
    %16 = vector.broadcast %cst_13 : f32 to vector<8x64xf32>
    %17 = arith.maximumf %15, %16 : vector<8x64xf32>
    %c1_14 = arith.constant 1 : index
    %c0_15 = arith.constant 0 : index
    %c0_16 = arith.constant 0 : index
    %18 = vector.load %arg4[%c1_14, %c0_15, %c0_16] : memref<2x64x64xf32, #tpu.memory_space<vmem>>, vector<1x64x64xf32>
    %19 = vector.shape_cast %18 : vector<1x64x64xf32> to vector<64x64xf32>
    %cst_17 = arith.constant dense<0.000000e+00> : vector<8x64xf32>
    %20 = tpu.matmul %17, %19, %cst_17 {dimension_numbers = #tpu.dot_dimension_numbers<[1], [0], [0], [1], [0, 0, 1, 1], [], []>} : vector<8x64xf32>, vector<64x64xf32>, vector<8x64xf32> -> vector<8x64xf32>
    %c2 = arith.constant 2 : index
    %c0_18 = arith.constant 0 : index
    %c0_19 = arith.constant 0 : index
    %21 = vector.load %arg5[%c2, %c0_18, %c0_19] : memref<3x1x64xf32, #tpu.memory_space<vmem>>, vector<1x1x64xf32>
    %22 = vector.shape_cast %21 : vector<1x1x64xf32> to vector<1x64xf32>
    %23 = vector.broadcast %22 : vector<1x64xf32> to vector<8x64xf32>
    %24 = arith.addf %20, %23 : vector<8x64xf32>
    %25 = vector.shape_cast %24 : vector<8x64xf32> to vector<1x8x64xf32>
    %26 = vector.extract_strided_slice %25 {offsets = [0, 0, 32], sizes = [1, 3, 32], strides = [1, 1, 1]} : vector<1x8x64xf32> to vector<1x3x32xf32>
    %c0_20 = arith.constant 0 : index
    %c0_21 = arith.constant 0 : index
    %c0_22 = arith.constant 0 : index
    %27 = vector.load %arg7[%c0_20, %c0_21, %c0_22] : memref<1x3x32xf32, #tpu.memory_space<vmem>>, vector<1x3x32xf32>
    tpu.vector_store %arg7[%c0_20, %c0_21, %c0_22], %26 {strides = array<i32>} : memref<1x3x32xf32, #tpu.memory_space<vmem>>, vector<1x3x32xf32>,
    %28 = vector.extract_strided_slice %25 {offsets = [0, 0, 0], sizes = [1, 8, 32], strides = [1, 1, 1]} : vector<1x8x64xf32> to vector<1x8x32xf32>
    %c0_23 = arith.constant 0 : index
    %c0_24 = arith.constant 0 : index
    %c0_25 = arith.constant 0 : index
    %29 = vector.load %arg2[%c0_23, %c0_24, %c0_25] : memref<1x32x256xf32, #tpu.memory_space<vmem>>, vector<1x32x256xf32>
    "tpu.trace_start"() <{level = 10 : i32, message = "btc,bch->bth"}> : () -> ()
    %cst_26 = arith.constant dense<0.000000e+00> : vector<1x8x256xf32>
    %30 = tpu.matmul %28, %29, %cst_26 {dimension_numbers = #tpu.dot_dimension_numbers<[2], [1], [1], [2], [0, 0, 0, 1, 1, 2], [0], [0]>} : vector<1x8x32xf32>, vector<1x32x256xf32>, vector<1x8x256xf32> -> vector<1x8x256xf32>
    "tpu.trace_stop"() : () -> ()
    %31 = vector.extract_strided_slice %30 {offsets = [0, 0, 0], sizes = [1, 3, 256], strides = [1, 1, 1]} : vector<1x8x256xf32> to vector<1x3x256xf32>
    %c0_27 = arith.constant 0 : index
    %c0_28 = arith.constant 0 : index
    %c0_29 = arith.constant 0 : index
    %32 = vector.load %arg6[%c0_27, %c0_28, %c0_29] : memref<1x3x256xf32, #tpu.memory_space<vmem>>, vector<1x3x256xf32>
    tpu.vector_store %arg6[%c0_27, %c0_28, %c0_29], %31 {strides = array<i32>} : memref<1x3x256xf32, #tpu.memory_space<vmem>>, vector<1x3x256xf32>,
    return
  }
  func.func @transform_0(%arg0: i32) -> (i32, i32) {
    %c0_i32 = arith.constant 0 : i32
    %c0_i32_0 = arith.constant 0 : i32
    return %arg0, %c0_i32 : i32, i32
  }
  func.func @transform_1(%arg0: i32) -> (i32, i32, i32) {
    %c0_i32 = arith.constant 0 : i32
    %c0_i32_0 = arith.constant 0 : i32
    %c0_i32_1 = arith.constant 0 : i32
    return %arg0, %c0_i32, %c0_i32_0 : i32, i32, i32
  }
  func.func @transform_2(%arg0: i32) -> (i32, i32) {
    %c0_i32 = arith.constant 0 : i32
    %c0_i32_0 = arith.constant 0 : i32
    %c0_i32_1 = arith.constant 0 : i32
    return %c0_i32, %c0_i32_0 : i32, i32
  }
  func.func @transform_3(%arg0: i32) -> (i32, i32, i32) {
    %c0_i32 = arith.constant 0 : i32
    %c0_i32_0 = arith.constant 0 : i32
    %c0_i32_1 = arith.constant 0 : i32
    %c0_i32_2 = arith.constant 0 : i32
    return %c0_i32, %c0_i32_0, %c0_i32_1 : i32, i32, i32
  }
  func.func @transform_4(%arg0: i32) -> (i32, i32, i32) {
    %c0_i32 = arith.constant 0 : i32
    %c0_i32_0 = arith.constant 0 : i32
    %c0_i32_1 = arith.constant 0 : i32
    %c0_i32_2 = arith.constant 0 : i32
    return %c0_i32, %c0_i32_0, %c0_i32_1 : i32, i32, i32
  }
  func.func @transform_5(%arg0: i32) -> (i32, i32, i32) {
    %c0_i32 = arith.constant 0 : i32
    %c0_i32_0 = arith.constant 0 : i32
    %c0_i32_1 = arith.constant 0 : i32
    return %arg0, %c0_i32, %c0_i32_0 : i32, i32, i32
  }
  func.func @transform_6(%arg0: i32) -> (i32, i32, i32) {
    %c0_i32 = arith.constant 0 : i32
    %c0_i32_0 = arith.constant 0 : i32
    %c0_i32_1 = arith.constant 0 : i32
    return %arg0, %c0_i32, %c0_i32_0 : i32, i32, i32
  }
}

</mosaic_0001>

<bundles_post_ra>
// kernel: tpu_custom_call.1
= control target key start
LH: loop header
LB: loop body
LE: loop exit
PB: predicated region body
PF: predicated region fallthrough
CT: control target
= control target key end

     0   :  { %12 = vsyncpa [#allocation3], 0  ;;  %s1464_s0 = inlined_call_operand.hbm [shape: f32[16,32], index: 0, kind: input, shape index: {}]   ;;  %s1465_s1 = inlined_call_operand.hbm [shape: f32[2,32,256], index: 1, kind: input, shape index: {}]   ;;  %s1466_s2 = inlined_call_operand.hbm [shape: f32[32,64], index: 2, kind: input, shape index: {}]   ;;  %s1467_s3 = inlined_call_operand.hbm [shape: f32[2,64,64], index: 3, kind: input, shape index: {}]   ;;  %s1468_s4 = inlined_call_operand.vmem [shape: f32[3,1,64], index: 4, kind: input, shape index: {}]   ;;  %s1469_s5 = inlined_call_operand.vmem [shape: f32[2,3,256], index: 5, kind: output, shape index: {0}]   ;;  %s1470_s6 = inlined_call_operand.vmem [shape: f32[2,3,32], index: 6, kind: output, shape index: {1}]  }
   0x1   :  { %14 = vsyncpa [#allocation3 + $0x1], 0 }
   0x2   :  { %15 = vsyncpa [#allocation5], 0 }
   0x3   :  { %17 = vsyncpa [#allocation5 + $0x1], 0 }
   0x4   :  { %18 = vsyncpa [#allocation8], 0  ;;  %s1226_s21 = smov 0   ;;  %s1228_s22 = smov 0  }
   0x5   :  { %s1230_s23 = smov 0   ;;  %s1232_s24 = smov 0  }
   0x6 LB: > { %s1245_s25 = sadd.s32 4294967295, %s1178_s24   ;;  %p44_p0 = scmp.ne.s32.totalorder %s1170_s22, %s1166_s21  ;;  %s1178_s24 = sphi %s1232_s24, %s1488_s24   ;;  %s1174_s23 = sphi %s1230_s23, %s1487_s23   ;;  %s1170_s22 = sphi %s1228_s22, %s1486_s22   ;;  %s1166_s21 = sphi %s1226_s21, %s1485_s21  }
   0x7   : > { %p1471_p1 = scmp.eq.s32.totalorder %s1245_s25, 0  ;;  %p850_p2 = scmp.ge.s32.totalorder %s1178_s24, 1 }
   0x8   : > { %p196_p3 = scmp.lt.s32.totalorder %s1178_s24, 3  ;;  %s1180_s28 = smov [#allocation6]  }
   0x9   : > { %p1253_p4 = por %p1471_p1, %p44_p0  ;;  %s208_s29 = sshll.u32 %s1180_s28, 4  ;;  %s209_s29 = int_to_ptr.vmem [resolvable:$true] %s208_s29 }
   0xa   : > { %p1257_p5 = pnand %p850_p2, %p196_p3  ;;  %s1181_s7 = smov [#allocation7]  }
   0xb   : > { %s1474_s26 = scalar_select %p1253_p4, 1, 0 }
   0xc   : > { %s1475_s27 = scalar_select %p1257_p5, 1, 0 }
   0xd   : > { %p964_p6 = pneg %p1257_p5  ;;  %s221_s8 = sshll.u32 %s1181_s7, 4  ;;  %s222_s8 = int_to_ptr.vmem [resolvable:$true] %s221_s8 }
   0xe   : > { %s1035_s9 = scalar_lea.vmem %s209_s29, 512  ;;  %p1043_p12 = scmp.lt.s32.totalorder %s209_s29, %s209_s29 }
   0xf   : > { %p1265_p7 = pnand %p964_p6, %p1471_p1  ;;  %p1036_p9 = scmp.ne.s32.totalorder %s209_s29, %s1035_s9 }
  0x10   : > { %p1044_p13 = scmp.lt.s32.totalorder %s1035_s9, %s1035_s9 }
  0x11   : > { %p1026_p8 = pneg %p1265_p7 }
  0x12   : > { %p1045_p0 = por %p1044_p13, %p1043_p12 }
  0x13   : > { %p1038_p10 = pnand %p1036_p9, %p1026_p8 }
  0x15   : > { %p1039_p11 = pneg %p1038_p10 }
  0x17   : > { %p1046_p2 = pnand %p1045_p0, %p1039_p11 }
  0x19   : > { %1049 = shalt.err (!%p1046_p2)
}
  0x1a   : > { %s1182_s10 = smov 128   ;;  %s1183_s11 = smov 8  }
  0x1b   : > { %967 = dma.hbm_to_vmem [thread:$0]  (!%p1265_p7), %s1466_s2, 512, %s209_s29, [#allocation5], %s1182_s10, %s1182_s10, %s1183_s11  }
  0x1c   : > { %s1061_s14 = scalar_lea.vmem %s222_s8, 2048  ;;  %p1069_p10 = scmp.lt.s32.totalorder %s222_s8, %s222_s8 }
  0x1d   : > { %p1062_p3 = scmp.ne.s32.totalorder %s222_s8, %s1061_s14  ;;  %p1070_p1 = scmp.lt.s32.totalorder %s1061_s14, %s1061_s14 }
  0x1f   : > { %p1064_p6 = pnand %p1062_p3, %p1026_p8  ;;  %p1071_p12 = por %p1070_p1, %p1069_p10 }
  0x21   : > { %p1065_p9 = pneg %p1064_p6 }
  0x23   : > { %p1072_p11 = pnand %p1071_p12, %p1065_p9 }
  0x25   : > { %1075 = shalt.err (!%p1072_p11)
}
  0x26   : > { %970 = dma.hbm_to_vmem [thread:$0]  (!%p1265_p7), %s1467_s3, 2048, %s222_s8, [#allocation8], %s1182_s10, %s1182_s10, %s1183_s11  }
  0x27   : > { %s1288_s17 = sadd.s32 1, %s1178_s24   ;;  %s31_s18 = sadd.s32 1, %s1174_s23 }
  0x28   : > { %s28_s19 = ssub.s32 %s1178_s24, %s1288_s17  ;;  %p38_p1 = scmp.ne.s32.totalorder %s1174_s23, %s1170_s22 }
  0x29   : > { %p29_p8 = scmp.eq.s32.totalorder %s28_s19, 0  ;;  %p39_p13 = scmp.eq.s32.totalorder %s1178_s24, 0 }
  0x2a   : > { %p980_p0 = scmp.lt.s32.totalorder %s1178_s24, 2  ;;  %s1298_s20 = sand.u32 1, %s1174_s23  }
  0x2b   : > { %s1301_s21 = scalar_select %p29_p8, %s1174_s23, %s31_s18  }
  0x2c   : > { %p40_p2 = por %p39_p13, %p38_p1  ;;  %s854_s28 = sshll.u32 %s1298_s20, 3 }
  0x2d   : > { %s855_s29 = sshll.u32 %s1178_s24, 7  ;;  %s242_s9 = scalar_lea.vmem [#allocation2], %s854_s28 }
  0x2e   : > { %s1308_s8 = scalar_lea.hbm %s1464_s0, %s855_s29  ;;  %s249_s10 = sshll.u32 %s242_s9, 4  ;;  %s250_s10 = int_to_ptr.vmem [resolvable:$true] %s249_s10 }
  0x2f   : > { %p1310_p7 = pnand %p980_p0, %p40_p2  ;;  %s856_s12 = sshll.u32 %s1298_s20, 6 }
  0x30   : > { %s239_s13 = scalar_lea.sflag [#allocation3], %s1298_s20  ;;  %s1076_s14 = scalar_lea.hbm %s1308_s8, 128 }
  0x31   : > { %p1077_p3 = scmp.ne.s32.totalorder %s1308_s8, %s1076_s14  ;;  %p1078_p6 = pneg %p1310_p7 }
  0x32   : > { %s1081_s18 = scalar_lea.hbm %s1464_s0, 256  ;;  %p1082_p12 = scmp.lt.s32.totalorder %s1308_s8, %s1464_s0 }
  0x33   : > { %p1079_p9 = pnand %p1078_p6, %p1077_p3  ;;  %p1083_p11 = scmp.lt.s32.totalorder %s1081_s18, %s1076_s14 }
  0x35   : > { %p1080_p10 = pneg %p1079_p9  ;;  %p1084_p1 = por %p1083_p11, %p1082_p12 }
  0x37   : > { %p1085_p8 = pnand %p1084_p1, %p1080_p10 }
  0x39   : > { %1088 = shalt.err (!%p1085_p8)
}
  0x3a   : > { %s1089_s20 = scalar_lea.vmem %s250_s10, 128  ;;  %s1184_s29 = smov [#allocation2]  }
  0x3b   : > { %p1090_p13 = scmp.ne.s32.totalorder %s250_s10, %s1089_s20  ;;  %s1094_s30 = sshll.u32 %s1184_s29, 4  ;;  %s1095_s30 = int_to_ptr.vmem [resolvable:$false] %s1094_s30 }
  0x3c   : > { %s1096_s7 = scalar_lea.vmem %s1095_s30, 256  ;;  %p1097_p3 = scmp.lt.s32.totalorder %s250_s10, %s1095_s30 }
  0x3d   : > { %p1092_p0 = pnand %p1090_p13, %p1078_p6  ;;  %p1098_p9 = scmp.lt.s32.totalorder %s1096_s7, %s1089_s20 }
  0x3f   : > { %p1093_p2 = pneg %p1092_p0  ;;  %p1099_p4 = por %p1098_p9, %p1097_p3 }
  0x41   : > { %p1100_p5 = pnand %p1099_p4, %p1093_p2 }
  0x43   : > { %1103 = shalt.err (!%p1100_p5)
}
  0x44   : > { %974 = dma.hbm_to_vmem [thread:$0]  (!%p1310_p7), %s1308_s8, 128, %s250_s10, %s239_s13  }
  0x45   : > { %s260_s9 = scalar_lea.vmem [#allocation4], %s856_s12  ;;  %s256_s15 = sand.u32 1, %s1178_s24  }
  0x46   : > { %s267_s14 = sshll.u32 %s260_s9, 4  ;;  %s878_s16 = sshll.u32 %s1178_s24, 10  ;;  %s1337_s14 = int_to_ptr.vmem [resolvable:$true] %s267_s14 }
  0x47   : > { %s1343_s28 = scalar_lea.hbm %s1465_s1, %s878_s16  ;;  %s1345_s20 = scalar_lea.sflag [#allocation5], %s256_s15 }
  0x48   : > { %s1104_s29 = scalar_lea.hbm %s1343_s28, 1024  ;;  %s1109_s24 = scalar_lea.hbm %s1465_s1, 2048 }
  0x49   : > { %p1105_p4 = scmp.ne.s32.totalorder %s1343_s28, %s1104_s29  ;;  %p1110_p12 = scmp.lt.s32.totalorder %s1343_s28, %s1465_s1 }
  0x4a   : > { %p1111_p11 = scmp.lt.s32.totalorder %s1109_s24, %s1104_s29 }
  0x4b   : > { %p1107_p5 = pnand %p1105_p4, %p1078_p6 }
  0x4c   : > { %p1112_p1 = por %p1111_p11, %p1110_p12 }
  0x4d   : > { %p1108_p10 = pneg %p1107_p5 }
  0x4f   : > { %p1113_p8 = pnand %p1112_p1, %p1108_p10 }
  0x51   : > { %1116 = shalt.err (!%p1113_p8)
}
  0x52   : > { %s1117_s30 = scalar_lea.vmem %s1337_s14, 1024  ;;  %s1185_s7 = smov [#allocation4]  }
  0x53   : > { %p1118_p13 = scmp.ne.s32.totalorder %s1337_s14, %s1117_s30  ;;  %s1122_s9 = sshll.u32 %s1185_s7, 4  ;;  %s1123_s9 = int_to_ptr.vmem [resolvable:$false] %s1122_s9 }
  0x54   : > { %s1124_s15 = scalar_lea.vmem %s1123_s9, 2048  ;;  %p1125_p3 = scmp.lt.s32.totalorder %s1337_s14, %s1123_s9 }
  0x55   : > { %p1120_p0 = pnand %p1118_p13, %p1078_p6  ;;  %p1126_p9 = scmp.lt.s32.totalorder %s1124_s15, %s1117_s30 }
  0x57   : > { %p1121_p2 = pneg %p1120_p0  ;;  %p1127_p4 = por %p1126_p9, %p1125_p3 }
  0x59   : > { %p1128_p5 = pnand %p1127_p4, %p1121_p2 }
  0x5b   : > { %1131 = shalt.err (!%p1128_p5)
}
  0x5c   : > { %s1186_s16 = smov 256   ;;  %s1187_s18 = smov 16  }
  0x5d   : > { %977 = dma.hbm_to_vmem [thread:$0]  (!%p1310_p7), %s1343_s28, 1024, %s1337_s14, %s1345_s20, %s1186_s16, %s1186_s16, %s1187_s18  }
  0x5e   : > { %p1478_p6 = scmp.ne.s32.totalorder %s1475_s27, 0 }
  0x5f   : > { %s281_s19 = sand.u32 (!%p1478_p6), 1, %s1170_s22   ;;  %p1479_p10 = scmp.ne.s32.totalorder (!%p1478_p6), %s1474_s26, 0 }
  0x60   : > { %279 = sbr.rel (%p1478_p6) target bundleno = 908 (0x38c), region = 40  ;;  %s860_s29 = sshll.u32 (!%p1478_p6), %s281_s19, 3 }
  0x61   : > { %s282_s8 = scalar_lea.sflag (!%p1478_p6), [#allocation3], %s281_s19  ;;  %s1373_s10 = scalar_lea.vmem (!%p1478_p6), [#allocation2], %s860_s29 }
  0x65   : > { %1149 = dma.done.wait (%p1479_p10), %s282_s8, 128  }
  0x66   : > { %1151 = vsyncadd (%p1479_p10), %s282_s8, 4294967168  ;;  %s290_s24 = sand.u32 1, %s1245_s25   ;;  %s861_s11 = sshll.u32 %s281_s19, 6 }
  0x67   : > { %s291_s14 = scalar_lea.sflag [#allocation5], %s290_s24  ;;  %s1380_s28 = scalar_lea.vmem [#allocation4], %s861_s11 }
  0x68   : > { %1153 = dma.done.wait (%p1479_p10), %s291_s14, 1024  }
  0x69   : > { %1155 = vsyncadd (%p1479_p10), %s291_s14, 4294966272  ;;  %p1480_p7 = scmp.eq.s32.totalorder %s1245_s25, 0 }
  0x6b   : > { %1157 = dma.done.wait (%p1480_p7), [#allocation5], 512   ;;  %p1481_p12 = pmov %p1480_p7 }
  0x6c   : > { %p1482_p11 = pmov %p1480_p7 }
  0x6d   : > { %1159 = vsyncadd (%p1481_p12), [#allocation5], 4294966784 }
  0x6e   : > { %1161 = dma.done.wait (%p1482_p11), [#allocation8], 2048   ;;  %p1483_p1 = pmov %p1480_p7 }
  0x6f   : > { %v1188_v0 = vmov 0.0   ;;  %vm1189_vm0 = vmmov 0   ;;  %v353_v1 = vld [vmem:[#allocation6 + $0x18] sm:$0xff]  ;;  %v352_v2 = vld [vmem:[#allocation6 + $0x10] sm:$0xff]  ;;  %v351_v4 = vld [vmem:[#allocation6 + $0x8] sm:$0xff]  ;;  %vm361_vm1 = vcmask 261120  }
  0x70   : > { %1163 = vsyncadd (%p1483_p1), [#allocation8], 4294965248  ;;  %903 = vmatprep.subr.mxu0 %v1188_v0  ;;  %911 = vmatprep.mubr.msk.f32.mxu0 %vm1189_vm0, %v1188_v0  ;;  %v443_v3 = vld [vmem:[#allocation7 + $0x38] sm:$0xff]  ;;  %v442_v5 = vld [vmem:[#allocation7 + $0x30] sm:$0xff]  ;;  %vm452_vm2 = vcmask 523264   ;;  %s1190_s7 = smov 96  }
  0x71   : > { %914 = vmatprep.subr.mxu1 %v1188_v0  ;;  %930 = vmatprep.mubr.msk.f32.mxu1 %vm1189_vm0, %v1188_v0  ;;  %v441_v6 = vld [vmem:[#allocation7 + $0x28] sm:$0xff]  ;;  %v350_v7 = vld [vmem:[#allocation6] sm:$0xff]  ;;  %v349_v8 = vld [vmem:[%s1373_s10] sm:$0xff]  ;;  %p340_p8 = scmp.lt.s32.totalorder %s1245_s25, 1  ;;  %vm621_vm3 = vcmask 256000  }
  0x72   : > { %904 = vmatpush3.msra.mxu0 %v353_v1  ;;  %915 = vmatpush3.msra.mxu1 %v443_v3  ;;  %v440_v9 = vld [vmem:[#allocation7 + $0x20] sm:$0xff]  ;;  %v439_v10 = vld [vmem:[#allocation7 + $0x18] sm:$0xff]  ;;  %v438_v11 = vld [vmem:[#allocation7 + $0x10] sm:$0xff] }
  0x73   : > { %905 = vmatprep.subr.mxu0 %v1188_v0  ;;  %916 = vmatprep.subr.mxu1 %v1188_v0  ;;  %v437_v12 = vld [vmem:[#allocation7 + $0x8] sm:$0xff]  ;;  %v436_v13 = vld [vmem:[#allocation7] sm:$0xff]  ;;  %v535_v14 = vld [vmem:[#allocation7 + $0x78] sm:$0xff]  ;;  %s1490_s25 = smov (!%p340_p8, %s1245_s25), 1 }
  0x74   : > { %906 = vmatpush3.msra.mxu0 %v352_v2  ;;  %917 = vmatpush3.msra.mxu1 %v442_v5  ;;  %v534_v15 = vld [vmem:[#allocation7 + $0x70] sm:$0xff]  ;;  %v533_v16 = vld [vmem:[#allocation7 + $0x68] sm:$0xff]  ;;  %v532_v17 = vld [vmem:[#allocation7 + $0x60] sm:$0xff]  ;;  %s866_s9 = sshll.u32 %s1490_s25, 2  ;;  %s879_s19 = sshll.u32 %s1490_s25, 3 }
  0x75   : > { %907 = vmatprep.subr.mxu0 %v1188_v0  ;;  %918 = vmatprep.subr.mxu1 %v1188_v0  ;;  %v531_v18 = vld [vmem:[#allocation7 + $0x58] sm:$0xff]  ;;  %v867_v19 = vld [vmem:[%s1468_s4] ss:$0 sm:$0xff]  ;;  %v529_v25 = vld [vmem:[#allocation7 + $0x48] sm:$0xff]  ;;  %s348_s18 = scalar_lea.vmem %s1470_s6, %s866_s9  ;;  %s344_s10 = scalar_lea.vmem %s1469_s5, %s879_s19 }
  0x76   : > { %908 = vmatpush3.msra.mxu0 %v351_v4  ;;  %919 = vmatpush3.msra.mxu1 %v441_v6  ;;  %v530_v24 = vld [vmem:[#allocation7 + $0x50] sm:$0xff]  ;;  %v528_v26 = vld [vmem:[#allocation7 + $0x40] sm:$0xff]  ;;  %v630_v27 = vld [vmem:[%s1380_s28 + $0x38] sm:$0xff] }
  0x77   : > { %909 = vmatprep.subr.mxu0 %v1188_v0  ;;  %920 = vmatprep.subr.mxu1 %v1188_v0  ;;  %v629_v28 = vld [vmem:[%s1380_s28 + $0x30] sm:$0xff]  ;;  %v628_v29 = vld [vmem:[%s1380_s28 + $0x28] sm:$0xff]  ;;  %v627_v30 = vld [vmem:[%s1380_s28 + $0x20] sm:$0xff] }
  0x78   : > { %910 = vmatpush3.msra.mxu0 %v350_v7  ;;  %921 = vmatpush3.msra.mxu1 %v440_v9  ;;  %v626_v31 = vld [vmem:[%s1380_s28 + $0x18] sm:$0xff]  ;;  %v870_v32 = vld [vmem:[%s1468_s4 + $0x1] ss:$0 sm:$0xff]  ;;  %v624_v38 = vld [vmem:[%s1380_s28 + $0x8] sm:$0xff] }
  0x79   : > { %912 = vmatmul.mubr.msk.f32.vlgmr.msra.gmra.mxu0 %vm361_vm1, %v349_v8  ;;  %922 = vmatprep.subr.mxu1 %v1188_v0  ;;  %v625_v37 = vld [vmem:[%s1380_s28 + $0x10] sm:$0xff]  ;;  %v623_v39 = vld [vmem:[%s1380_s28] sm:$0xff] }
  0x7a   : > { %933 = vmatprep.subr.mxu0 %v1188_v0  ;;  %923 = vmatpush3.msra.mxu1 %v439_v10  ;;  %v873_v40 = vld [vmem:[%s1468_s4 + $0x2] ss:$0 sm:$0xff] }
  0x7b   : > { %949 = vmatprep.mubr.msk.f32.mxu0 %vm1189_vm0, %v1188_v0  ;;  %924 = vmatprep.subr.mxu1 %v1188_v0 }
  0x7c   : > { %925 = vmatpush3.msra.mxu1 %v438_v11  ;;  %934 = vmatpush3.msra.mxu0 %v535_v14 }
  0x7d   : > { %926 = vmatprep.subr.mxu1 %v1188_v0  ;;  %935 = vmatprep.subr.mxu0 %v1188_v0 }
  0x7e   : > { %927 = vmatpush3.msra.mxu1 %v437_v12  ;;  %936 = vmatpush3.msra.mxu0 %v534_v15 }
  0x7f   : > { %928 = vmatprep.subr.mxu1 %v1188_v0  ;;  %937 = vmatprep.subr.mxu0 %v1188_v0 }
  0x80   : > { %929 = vmatpush3.msra.mxu1 %v436_v13  ;;  %938 = vmatpush3.msra.mxu0 %v533_v16 }
  0x81   : > { %939 = vmatprep.subr.mxu0 %v1188_v0  ;;  %657 = vmatprep.subr.mxu1 %v630_v27 }
  0x82   : > { %940 = vmatpush3.msra.mxu0 %v532_v17 }
  0x83   : > { %941 = vmatprep.subr.mxu0 %v1188_v0 }
  0x84   : > { %942 = vmatpush3.msra.mxu0 %v531_v18 }
  0x85   : > { %943 = vmatprep.subr.mxu0 %v1188_v0 }
  0x86   : > { %944 = vmatpush3.msra.mxu0 %v530_v24 }
  0x87   : > { %945 = vmatprep.subr.mxu0 %v1188_v0 }
  0x88   : > { %946 = vmatpush3.msra.mxu0 %v529_v25 }
  0x89   : > { %947 = vmatprep.subr.mxu0 %v1188_v0 }
  0x8a   : > { %948 = vmatpush3.msra.mxu0 %v528_v26 }
 0x139   : > { %v431_v20 = vpop.f32.mrf.mxu0 }
 0x13a   : > { %v432_v21 = vadd.f32 %v867_v19, %v431_v20 }
 0x13b   : > { %v913_v22 = vpop.f32.mrf.mxu0 }
 0x13c   : > { %v435_v23 = vmax.f32 %v432_v21, 0.0 }
 0x13e   : > { %931 = vmatmul.mubr.msk.f32.vlgmr.msra.gmra.mxu1 %vm452_vm2, %v435_v23 }
 0x13f   : > { %697 = vmatprep.mubr.f32.mxu1 %v1188_v0  ;;  %658 = vmatpush1.msra.mxu1 %v629_v28 }
 0x140   : > { %659 = vmatprep.subr.mxu1 %v628_v29 }
 0x141   : > { %660 = vmatpush1.msra.mxu1 %v627_v30 }
 0x142   : > { %661 = vmatprep.subr.mxu1 %v626_v31 }
 0x143   : > { %662 = vmatpush1.msra.mxu1 %v625_v37 }
 0x144   : > { %663 = vmatprep.subr.mxu1 %v624_v38 }
 0x145   : > { %664 = vmatpush1.msra.mxu1 %v623_v39 }
 0x1fe   : > { %v522_v33 = vpop.f32.mrf.mxu1 }
 0x1ff   : > { %v523_v34 = vadd.f32 %v870_v32, %v522_v33 }
 0x200   : > { %v932_v35 = vpop.f32.mrf.mxu1 }
 0x201   : > { %v526_v36 = vmax.f32 %v523_v34, 0.0 }
 0x203   : > { %950 = vmatmul.mubr.msk.f32.vlgmr.msra.gmra.mxu0 %vm452_vm2, %v526_v36 }
 0x2c3   : > { %v613_v41 = vpop.f32.mrf.mxu0 }
 0x2c4   : > { %v614_v42 = vadd.f32 %v873_v40, %v613_v41 }
 0x2c5   : > { %v951_v43 = vpop.f32.mrf.mxu0 }
 0x2c6   : > { %618 = vrot.lane.b32.xlu0 %v614_v42, %s1190_s7  ;;  %875 = vmatmul.mubr.msk.f32.vlgmr.msra.gmra.mxu1 %vm361_vm1, %v614_v42 }
 0x338   : > { %v619_v44 = vpop.permute.xlu0 %618 }
 0x339   : > { %622 = vst.msk [vmem:[%s348_s18] sm:$0x7] %vm621_vm3, %v619_v44 }
 0x386   : > { %v699_v45 = vpop.f32.mrf.mxu1 }
 0x388   : > { %v701_v46 = vpop.f32.mrf.mxu1 }
 0x389   : > { %v706_v47 = vcombine.low %v699_v45, %v701_v46 }
 0x38b   : > { %708 = vst [vmem:[%s344_s10] sm:$0x77] %v706_v47 }
 0x38c PF: > { %s1484_s24 = smov %s1301_s21  ;;  %p21_p13 = scmp.ge.s32.totalorder %s1288_s17, 4  }
 0x38d   : > { %s1485_s21 = smov %s1170_s22  ;;  %s1486_s22 = smov %s1174_s23 }
 0x38e   : > { %s1487_s23 = smov %s1484_s24  ;;  %s1488_s24 = smov %s1288_s17 }
 0x38f   :  { %23 = sbr.rel (!%p21_p13) target bundleno = 6 (0x6), region = 116 }
 0x394   :  { %744 = vsyncpa [#allocation3], 1 }
 0x395   :  { %746 = vsyncpa [#allocation3 + $0x1], 1 }
 0x396   :  { %747 = vsyncpa [#allocation5], 1 }
 0x397   :  { %749 = vsyncpa [#allocation5 + $0x1], 1 }
 0x398   :  { %750 = vsyncpa [#allocation8], 1 }

</bundles_post_ra>
